<compile_context>
chip_gen: v5e
topology: v5e:2x2
jax: 0.10.0
libtpu: 0.0.40
codegen_flags: <defaults>
</compile_context>

<pallas_src>
import functools

import jax
import jax.numpy as jnp
from jax.experimental import pallas as pl
from jax.experimental.pallas import tpu as pltpu


_NEG_INF = -9e15                        # matches pyGAT's masking constant


def _vmem_budget_bytes():
    """~75% of physical VMEM (96 MiB v5e/v6e, 48 MiB v7x); used both as the Mosaic
    vmem limit and as the budget when picking the row-block size."""
    try:
        phys = int(pltpu.get_tpu_info().vmem_capacity_bytes)
    except Exception:                    # pragma: no cover - conservative fallback
        phys = 64 * 1024 * 1024          # v7x-sized if the query is unavailable
    return max(32 * 1024 * 1024, (phys * 3) // 4)


def _pick_tm(n, *, resident_bytes, per_row_bytes, budget, cap=1024):
    """Largest row block tm that (a) divides n, (b) is a multiple of 32 (int8 adj
    native tile is (32,128); f32/bf16 need 8/16), and (c) keeps the streamed/live
    per-block working set inside the VMEM budget."""
    avail = max(budget - resident_bytes, 32 * per_row_bytes)
    cap = min(cap, n, max(32, avail // per_row_bytes))
    best = None
    tm = 32
    while tm <= cap:
        if n % tm == 0:
            best = tm
        tm += 32
    if best is None:
        # TODO(synk): ragged N (no multiple-of-32 divisor) -> single full block;
        # padding adj would be needed to tile such graphs on big N.
        return n
    return best


# ----------------------------------------------------------------------------
# Kernels
# ----------------------------------------------------------------------------
def _proj_kernel(x_ref, w_ref, a1_ref, a2_ref, wh_ref, f1_ref, f2_ref):
    """Wh = x @ W (all heads, bf16 in / bf16 out, f32 accumulation);
    f1/f2 = Wh @ blockdiag(a1/a2) computed from the f32 accumulator."""
    wh = jnp.dot(x_ref[...], w_ref[...], preferred_element_type=jnp.float32)
    wh_ref[...] = wh.astype(wh_ref.dtype)          # bf16, already in attention layout
    f1_ref[...] = jnp.dot(wh, a1_ref[...], preferred_element_type=jnp.float32)
    f2_ref[...] = jnp.dot(wh, a2_ref[...], preferred_element_type=jnp.float32)


def _heads_attn_kernel(adj_ref, wh_ref, f1_ref, f2_ref, wo_ref, whout_ref,
                       *, alpha, nheads, nhid, exp_dtype):
    """All attention heads for one row block of nodes, fused with the layer-2
    projection (wh_out = elu-concat(heads) @ W_out)."""
    # Mask bias hoisted out of the head loop: one select per adj element per block.
    adjf = adj_ref[...].astype(jnp.float32)        # int8 -> f32, one pass per block
    bias = jnp.where(adjf > 0.0, 0.0, _NEG_INF)
    # NOTE: e + bias == where(adj>0, e, NEG) after softmax except for fully-isolated
    # rows (no neighbours), which are degenerate for GAT anyway.

    heads = []
    for h in range(nheads):                        # static, small loop
        # e[i, j] = f1[i] + f2[j]  (lane vectors precomputed by the projection kernel)
        e = f1_ref[h] + f2_ref[h]                  # (tm, 1) + (1, N) -> (tm, N)
        e = jnp.maximum(e, alpha * e) + bias       # LeakyReLU + adjacency mask
        m = jnp.max(e, axis=1, keepdims=True)
        p = jnp.exp((e - m).astype(exp_dtype))     # exp_dtype=bf16 -> v6e/v7x EUP path
        denom = jnp.sum(p.astype(jnp.float32), axis=1, keepdims=True)  # f32 accum

        # Dominant matmul in bf16 with f32 accumulation; softmax normalisation is
        # applied AFTER the matmul (linear), i.e. on (tm, nhid) instead of (tm, N).
        hp = jnp.dot(p.astype(jnp.bfloat16),
                     wh_ref[:, h * nhid:(h + 1) * nhid],
                     preferred_element_type=jnp.float32)                # (tm, H)
        hp = hp * pl.reciprocal(denom)             # exact reciprocal; (tm,1) is cheap
        # ELU (concat=True head).  exp(min(x,0))-1 kept for Mosaic-lowering safety.
        heads.append(jnp.where(hp > 0.0, hp, jnp.exp(jnp.minimum(hp, 0.0)) - 1.0))

    # Fused layer-2 projection: ONE (tm, nheads*H) @ (nheads*H, C) MXU matmul instead
    # of nheads K=8 pushes + running adds.
    hcat = jnp.concatenate(heads, axis=1)
    whout_ref[...] = jnp.dot(hcat, wo_ref[...], preferred_element_type=jnp.float32)


def _out_attn_kernel(adj_ref, wh_ref, g1_ref, g2_ref, out_ref, *, alpha):
    """Output attention layer (concat=False) + GAT.forward's elu + log_softmax."""
    adjf = adj_ref[...].astype(jnp.float32)
    bias = jnp.where(adjf > 0.0, 0.0, _NEG_INF)
    e = g1_ref[...] + g2_ref[...]                  # (tm, 1) + (1, N)
    e = jnp.maximum(e, alpha * e) + bias           # LeakyReLU + adjacency mask
    m = jnp.max(e, axis=1, keepdims=True)
    p = jnp.exp(e - m)                             # final layer kept in f32
    denom = jnp.sum(p, axis=1, keepdims=True)
    hp = jnp.dot(p, wh_ref[...], preferred_element_type=jnp.float32)   # (tm, C)
    hp = hp * pl.reciprocal(denom)                 # normalise after the matmul
    h = jnp.where(hp > 0.0, hp, jnp.exp(jnp.minimum(hp, 0.0)) - 1.0)   # ELU
    mm = jnp.max(h, axis=1, keepdims=True)
    lse = jnp.log(jnp.sum(jnp.exp(h - mm), axis=1, keepdims=True)) + mm
    out_ref[...] = h - lse                         # log_softmax
    # TODO(synk): pad C to 128 lanes if masked (tm,C) stores ever become a bottleneck.


# ----------------------------------------------------------------------------
# pallas_call wrappers
# ----------------------------------------------------------------------------
def _project(x_bf, W_all, A1, A2, *, tm, vmem_limit):
    N, Fin = x_bf.shape
    K, nheads = A1.shape                       # K = nheads * nhid
    ce = pl.CostEstimate(
        flops=int(2 * N * Fin * K + 4 * N * K * nheads),
        transcendentals=0,
        bytes_accessed=int(2 * N * Fin + 2 * Fin * K + 8 * K * nheads
                           + 2 * N * K + 8 * N * nheads))
    return pl.pallas_call(
        _proj_kernel,
        out_shape=(
            jax.ShapeDtypeStruct((N, K), jnp.bfloat16),     # Wh (attention layout)
            jax.ShapeDtypeStruct((N, nheads), jnp.float32),  # f1
            jax.ShapeDtypeStruct((N, nheads), jnp.float32),  # f2
        ),
        grid_spec=pltpu.PrefetchScalarGridSpec(
            num_scalar_prefetch=0,
            grid=(N // tm,),
            in_specs=[
                pl.BlockSpec((tm, Fin), lambda r: (r, 0)),   # x row block (bf16)
                pl.BlockSpec((Fin, K), lambda r: (0, 0)),    # W all heads (resident)
                pl.BlockSpec((K, nheads), lambda r: (0, 0)),  # blockdiag a1
                pl.BlockSpec((K, nheads), lambda r: (0, 0)),  # blockdiag a2
            ],
            out_specs=(
                pl.BlockSpec((tm, K), lambda r: (r, 0)),
                pl.BlockSpec((tm, nheads), lambda r: (r, 0)),
                pl.BlockSpec((tm, nheads), lambda r: (r, 0)),
            ),
        ),
        compiler_params=pltpu.CompilerParams(
            dimension_semantics=("parallel",), vmem_limit_bytes=vmem_limit),
        cost_estimate=ce,
    )(x_bf, W_all, A1, A2)


def _heads_attention(adj_i8, wh_bf, f1_h, f2_h, W_out, *,
                     alpha, nheads, nhid, tm, exp_dtype, vmem_limit):
    N = adj_i8.shape[0]
    K, C = W_out.shape                         # K = nheads * nhid
    ce = pl.CostEstimate(
        flops=int(nheads * (2 * N * N * nhid + 6 * N * N) + 2 * N * K * C),
        transcendentals=int(nheads * N * N),
        bytes_accessed=int(N * N + 2 * N * K + 8 * N * nheads + 4 * K * C + 4 * N * C))
    return pl.pallas_call(
        functools.partial(_heads_attn_kernel, alpha=alpha, nheads=nheads,
                          nhid=nhid, exp_dtype=exp_dtype),
        out_shape=jax.ShapeDtypeStruct((N, C), jnp.float32),
        grid_spec=pltpu.PrefetchScalarGridSpec(
            num_scalar_prefetch=0,
            grid=(N // tm,),
            in_specs=[
                pl.BlockSpec((tm, N), lambda r: (r, 0)),             # adj int8, streamed
                pl.BlockSpec((N, K), lambda r: (0, 0)),              # Wh bf16 (resident)
                pl.BlockSpec((nheads, tm, 1), lambda r: (0, r, 0)),  # f1 row block
                pl.BlockSpec((nheads, 1, N), lambda r: (0, 0, 0)),   # f2^T (resident)
                pl.BlockSpec((K, C), lambda r: (0, 0)),              # W_out (resident)
            ],
            out_specs=pl.BlockSpec((tm, C), lambda r: (r, 0)),
        ),
        compiler_params=pltpu.CompilerParams(
            dimension_semantics=("parallel",), vmem_limit_bytes=vmem_limit),
        cost_estimate=ce,
    )(adj_i8, wh_bf, f1_h, f2_h, W_out)


def _out_attention(adj_i8, wh_out, g1, g2t, *, alpha, tm, vmem_limit):
    N = adj_i8.shape[0]
    C = wh_out.shape[1]
    ce = pl.CostEstimate(
        flops=int(2 * N * N * C + 6 * N * N + 8 * N * C),
        transcendentals=int(N * N + 2 * N * C),
        bytes_accessed=int(N * N + 4 * N * C + 8 * N + 4 * N * C))
    return pl.pallas_call(
        functools.partial(_out_attn_kernel, alpha=alpha),
        out_shape=jax.ShapeDtypeStruct((N, C), jnp.float32),
        grid_spec=pltpu.PrefetchScalarGridSpec(
            num_scalar_prefetch=0,
            grid=(N // tm,),
            in_specs=[
                pl.BlockSpec((tm, N), lambda r: (r, 0)),   # adj int8, streamed
                pl.BlockSpec((N, C), lambda r: (0, 0)),    # wh_out (resident)
                pl.BlockSpec((tm, 1), lambda r: (r, 0)),   # g1 row block
                pl.BlockSpec((1, N), lambda r: (0, 0)),    # g2^T (resident)
            ],
            out_specs=pl.BlockSpec((tm, C), lambda r: (r, 0)),
        ),
        compiler_params=pltpu.CompilerParams(
            dimension_semantics=("parallel",), vmem_limit_bytes=vmem_limit),
        cost_estimate=ce,
    )(adj_i8, wh_out, g1, g2t)


# ----------------------------------------------------------------------------
# Full forward
# ----------------------------------------------------------------------------
def gat_forward(x, adj, params, *, alpha, tm=None, exp_dtype=jnp.float32):
    """Full GAT forward (eval mode: all dropout layers are identity).

    exp_dtype: jnp.float32 (exact, works everywhere) or jnp.bfloat16 (uses the bf16
    EUP path on v6e/v7x for the N^2 softmax exps; slightly lower precision).
    """
    # TODO(synk): training-mode dropout (input / inter-layer / attention) omitted.
    W_heads = params["W_heads"]                  # (nheads, F, H)
    nheads, F, H = W_heads.shape
    N = x.shape[0]
    C = params["W_out"].shape[1]
    K = nheads * H

    budget = _vmem_budget_bytes()
    if tm is None:
        resident = (N * max(K, 128) * 2          # Wh bf16 (lane-padded to >=128)
                    + nheads * 8 * N * 4         # f2 rows (sublane-padded)
                    + N * max(C, 128) * 4)       # wh_out resident in the output layer
        per_row = 2 * N + 6 * 4 * N              # 2x int8 adj (dbuf) + ~6 live f32 rows
        tm = _pick_tm(N, resident_bytes=resident, per_row_bytes=per_row, budget=budget)
    assert N % tm == 0, "row block must divide N"

    # int8 adjacency: 4x less HBM traffic on the dominant N^2 stream (read twice).
    adj_i8 = adj if adj.dtype == jnp.int8 else (adj > 0).astype(jnp.int8)

    # ---- layer-1 projection: one wide bf16 matmul for all heads -----------------
    W_all = jnp.transpose(W_heads, (1, 0, 2)).reshape(F, K).astype(jnp.bfloat16)
    x_bf = x.astype(jnp.bfloat16)
    eye = jnp.eye(nheads, dtype=jnp.float32)
    A1 = (params["a1_heads"][:, :, None] * eye[:, None, :]).reshape(K, nheads)
    A2 = (params["a2_heads"][:, :, None] * eye[:, None, :]).reshape(K, nheads)
    wh_bf, f1, f2 = _project(x_bf, W_all, A1, A2, tm=tm, vmem_limit=budget)

    # tiny O(N*nheads) relayouts (XLA; negligible vs the adj stream)
    f1_h = jnp.transpose(f1)[:, :, None]         # (nheads, N, 1)
    f2_h = jnp.transpose(f2)[:, None, :]         # (nheads, 1, N)

    # ---- layer-1 attention (all heads) fused with the layer-2 projection --------
    wh_out = _heads_attention(adj_i8, wh_bf, f1_h, f2_h, params["W_out"],
                              alpha=alpha, nheads=nheads, nhid=H, tm=tm,
                              exp_dtype=exp_dtype, vmem_limit=budget)

    # tiny O(N*C) score projections in XLA (replaces the masked (tm,1) kernel stores)
    g1 = wh_out @ params["a1_out"][:, None]              # (N, 1)
    g2t = (wh_out @ params["a2_out"][:, None]).reshape(1, N)

    # ---- layer-2 attention + elu + log_softmax ----------------------------------
    return _out_attention(adj_i8, wh_out, g1, g2t, alpha=alpha, tm=tm,
                          vmem_limit=budget)


# ----------------------------------------------------------------------------
# Parameter init (deterministic, Xavier-uniform like the reference)
# ----------------------------------------------------------------------------
def init_params(key, nfeat, nhid, nclass, nheads):
    ks = jax.random.split(key, 4)

    def xavier(k, shape, gain=1.414):
        fan_in, fan_out = shape[-2], shape[-1]
        bound = gain * jnp.sqrt(6.0 / (fan_in + fan_out))
        return jax.random.uniform(k, shape, jnp.float32, -bound, bound)

    a_heads = xavier(ks[1], (nheads, 2 * nhid, 1))
    a_out = xavier(ks[3], (2 * nclass, 1))
    return {
        "W_heads": xavier(ks[0], (nheads, nfeat, nhid)),   # per-head W
        "a1_heads": a_heads[:, :nhid, 0],                  # (nheads, nhid)
        "a2_heads": a_heads[:, nhid:, 0],                  # (nheads, nhid)
        "W_out": xavier(ks[2], (nheads * nhid, nclass)),
        "a1_out": a_out[:nclass, 0],                       # (nclass,)
        "a2_out": a_out[nclass:, 0],                       # (nclass,)
    }


# ----------------------------------------------------------------------------
# Pure-JAX reference (matches the PyTorch module in eval mode)
# ----------------------------------------------------------------------------
def reference_forward(x, adj, params, *, alpha):
    def layer(h, W, a1, a2, concat):
        wh = h @ W
        e = wh @ a1[:, None] + (wh @ a2[:, None]).T
        e = jnp.where(e > 0, e, alpha * e)
        e = jnp.where(adj > 0, e, _NEG_INF)
        att = jax.nn.softmax(e, axis=1)
        out = att @ wh
        return jax.nn.elu(out) if concat else out

    nheads = params["W_heads"].shape[0]
    heads = [layer(x, params["W_heads"][h], params["a1_heads"][h],
                   params["a2_heads"][h], True) for h in range(nheads)]
    hcat = jnp.concatenate(heads, axis=1)
    out = layer(hcat, params["W_out"], params["a1_out"], params["a2_out"], False)
    return jax.nn.log_softmax(jax.nn.elu(out), axis=1)


# ----------------------------------------------------------------------------
# Demo
# ----------------------------------------------------------------------------
if __name__ == "__main__":
    N, nfeat, nhid, nclass, nheads = 64, 16, 8, 4, 2
    alpha = 0.2

    key = jax.random.PRNGKey(0)
    kx, kadj, kp = jax.random.split(key, 3)

    x = jax.random.normal(kx, (N, nfeat), jnp.float32)
    # deterministic sparse-ish adjacency with self-loops
    adj = (jax.random.uniform(kadj, (N, N)) < 0.2).astype(jnp.float32)
    adj = jnp.maximum(adj, jnp.eye(N, dtype=jnp.float32))

    params = init_params(kp, nfeat, nhid, nclass, nheads)
    ref = reference_forward(x, adj, params, alpha=alpha)

    # (1) f32-exp path, explicit tm=32 -> 2 row blocks (exercises the streamed grid).
    out = jax.block_until_ready(gat_forward(x, adj, params, alpha=alpha, tm=32))
    assert out.shape == (N, nclass)
    assert bool(jnp.all(jnp.isfinite(out)))
    # rows of log_softmax must sum to ~1 in prob space
    assert bool(jnp.allclose(jnp.sum(jnp.exp(out), axis=1), 1.0, atol=1e-3))
    # loose tol: bf16 projection + bf16 attention matmuls on the MXU
    assert bool(jnp.allclose(out, ref, atol=0.2)), float(jnp.max(jnp.abs(out - ref)))

    # (2) auto tile size + bf16-exp (v6e/v7x EUP) path; reduced-precision sanity check.
    out_bf = jax.block_until_ready(
        gat_forward(x, adj, params, alpha=alpha, exp_dtype=jnp.bfloat16))
    assert out_bf.shape == (N, nclass)
    assert bool(jnp.all(jnp.isfinite(out_bf)))
    assert bool(jnp.allclose(jnp.sum(jnp.exp(out_bf), axis=1), 1.0, atol=1e-3))
    assert bool(jnp.allclose(out_bf, ref, atol=0.5))

    print("KERNEL_OK")
</pallas_src>

<mosaic_0001>
module attributes {stable_mosaic.version = 11 : i64} {
  func.func @_proj_kernel(%arg0: i32, %arg1: memref<32x16xbf16, #tpu.memory_space<vmem>>, %arg2: memref<16x16xbf16, #tpu.memory_space<vmem>>, %arg3: memref<16x2xf32, #tpu.memory_space<vmem>>, %arg4: memref<16x2xf32, #tpu.memory_space<vmem>>, %arg5: memref<32x16xbf16, #tpu.memory_space<vmem>>, %arg6: memref<32x2xf32, #tpu.memory_space<vmem>>, %arg7: memref<32x2xf32, #tpu.memory_space<vmem>>) attributes {dimension_semantics = [#tpu.dimension_semantics<parallel>], iteration_bounds = array<i64: 2>, scalar_prefetch = 0 : i64, scratch_operands = 0 : i64, tpu.core_type = #tpu.core_type<tc>, window_params = [{transform_indices = @transform_0, window_bounds = array<i64: 32, 16>}, {pipeline_mode = #tpu.pipeline_mode<synchronous>, transform_indices = @transform_1, window_bounds = array<i64: 16, 16>}, {pipeline_mode = #tpu.pipeline_mode<synchronous>, transform_indices = @transform_2, window_bounds = array<i64: 16, 2>}, {pipeline_mode = #tpu.pipeline_mode<synchronous>, transform_indices = @transform_3, window_bounds = array<i64: 16, 2>}, {transform_indices = @transform_4, window_bounds = array<i64: 32, 16>}, {transform_indices = @transform_5, window_bounds = array<i64: 32, 2>}, {transform_indices = @transform_6, window_bounds = array<i64: 32, 2>}]} {
    %c0 = arith.constant 0 : index
    %c0_0 = arith.constant 0 : index
    %0 = vector.load %arg1[%c0, %c0_0] : memref<32x16xbf16, #tpu.memory_space<vmem>>, vector<32x16xbf16>
    %c0_1 = arith.constant 0 : index
    %c0_2 = arith.constant 0 : index
    %1 = vector.load %arg2[%c0_1, %c0_2] : memref<16x16xbf16, #tpu.memory_space<vmem>>, vector<16x16xbf16>
    %cst = arith.constant dense<0.000000e+00> : vector<32x16xf32>
    %2 = tpu.matmul %0, %1, %cst {dimension_numbers = #tpu.dot_dimension_numbers<[1], [0], [0], [1], [0, 0, 1, 1], [], []>} : vector<32x16xbf16>, vector<16x16xbf16>, vector<32x16xf32> -> vector<32x16xf32>
    %3 = arith.truncf %2 : vector<32x16xf32> to vector<32x16xbf16>
    %c0_3 = arith.constant 0 : index
    %c0_4 = arith.constant 0 : index
    %4 = vector.load %arg5[%c0_3, %c0_4] : memref<32x16xbf16, #tpu.memory_space<vmem>>, vector<32x16xbf16>
    tpu.vector_store %arg5[%c0_3, %c0_4], %3 {strides = array<i32>} : memref<32x16xbf16, #tpu.memory_space<vmem>>, vector<32x16xbf16>,
    %c0_5 = arith.constant 0 : index
    %c0_6 = arith.constant 0 : index
    %5 = vector.load %arg3[%c0_5, %c0_6] : memref<16x2xf32, #tpu.memory_space<vmem>>, vector<16x2xf32>
    %cst_7 = arith.constant dense<0.000000e+00> : vector<32x2xf32>
    %6 = tpu.matmul %2, %5, %cst_7 {dimension_numbers = #tpu.dot_dimension_numbers<[1], [0], [0], [1], [0, 0, 1, 1], [], []>} : vector<32x16xf32>, vector<16x2xf32>, vector<32x2xf32> -> vector<32x2xf32>
    %c0_8 = arith.constant 0 : index
    %c0_9 = arith.constant 0 : index
    %7 = vector.load %arg6[%c0_8, %c0_9] : memref<32x2xf32, #tpu.memory_space<vmem>>, vector<32x2xf32>
    tpu.vector_store %arg6[%c0_8, %c0_9], %6 {strides = array<i32>} : memref<32x2xf32, #tpu.memory_space<vmem>>, vector<32x2xf32>,
    %c0_10 = arith.constant 0 : index
    %c0_11 = arith.constant 0 : index
    %8 = vector.load %arg4[%c0_10, %c0_11] : memref<16x2xf32, #tpu.memory_space<vmem>>, vector<16x2xf32>
    %cst_12 = arith.constant dense<0.000000e+00> : vector<32x2xf32>
    %9 = tpu.matmul %2, %8, %cst_12 {dimension_numbers = #tpu.dot_dimension_numbers<[1], [0], [0], [1], [0, 0, 1, 1], [], []>} : vector<32x16xf32>, vector<16x2xf32>, vector<32x2xf32> -> vector<32x2xf32>
    %c0_13 = arith.constant 0 : index
    %c0_14 = arith.constant 0 : index
    %10 = vector.load %arg7[%c0_13, %c0_14] : memref<32x2xf32, #tpu.memory_space<vmem>>, vector<32x2xf32>
    tpu.vector_store %arg7[%c0_13, %c0_14], %9 {strides = array<i32>} : memref<32x2xf32, #tpu.memory_space<vmem>>, vector<32x2xf32>,
    return
  }
  func.func @transform_0(%arg0: i32) -> (i32, i32) {
    %c0_i32 = arith.constant 0 : i32
    %c0_i32_0 = arith.constant 0 : i32
    return %arg0, %c0_i32 : i32, i32
  }
  func.func @transform_1(%arg0: i32) -> (i32, i32) {
    %c0_i32 = arith.constant 0 : i32
    %c0_i32_0 = arith.constant 0 : i32
    %c0_i32_1 = arith.constant 0 : i32
    return %c0_i32, %c0_i32_0 : i32, i32
  }
  func.func @transform_2(%arg0: i32) -> (i32, i32) {
    %c0_i32 = arith.constant 0 : i32
    %c0_i32_0 = arith.constant 0 : i32
    %c0_i32_1 = arith.constant 0 : i32
    return %c0_i32, %c0_i32_0 : i32, i32
  }
  func.func @transform_3(%arg0: i32) -> (i32, i32) {
    %c0_i32 = arith.constant 0 : i32
    %c0_i32_0 = arith.constant 0 : i32
    %c0_i32_1 = arith.constant 0 : i32
    return %c0_i32, %c0_i32_0 : i32, i32
  }
  func.func @transform_4(%arg0: i32) -> (i32, i32) {
    %c0_i32 = arith.constant 0 : i32
    %c0_i32_0 = arith.constant 0 : i32
    return %arg0, %c0_i32 : i32, i32
  }
  func.func @transform_5(%arg0: i32) -> (i32, i32) {
    %c0_i32 = arith.constant 0 : i32
    %c0_i32_0 = arith.constant 0 : i32
    return %arg0, %c0_i32 : i32, i32
  }
  func.func @transform_6(%arg0: i32) -> (i32, i32) {
    %c0_i32 = arith.constant 0 : i32
    %c0_i32_0 = arith.constant 0 : i32
    return %arg0, %c0_i32 : i32, i32
  }
}

</mosaic_0001>

<bundles_post_ra>
// kernel: tpu_custom_call.1
= control target key start
LH: loop header
LB: loop body
LE: loop exit
PB: predicated region body
PF: predicated region fallthrough
CT: control target
= control target key end

     0   :  { %s643_s21 = smov 0   ;;  %s707_s0 = inlined_call_operand.vmem [shape: bf16[64,16], index: 0, kind: input, shape index: {}]   ;;  %s708_s1 = inlined_call_operand.vmem [shape: bf16[16,16], index: 1, kind: input, shape index: {}]   ;;  %s709_s2 = inlined_call_operand.vmem [shape: f32[16,2], index: 2, kind: input, shape index: {}]   ;;  %s710_s3 = inlined_call_operand.vmem [shape: f32[16,2], index: 3, kind: input, shape index: {}]   ;;  %s711_s4 = inlined_call_operand.vmem [shape: bf16[64,16], index: 4, kind: output, shape index: {0}]   ;;  %s712_s5 = inlined_call_operand.vmem [shape: f32[64,2], index: 5, kind: output, shape index: {1}]   ;;  %s713_s6 = inlined_call_operand.vmem [shape: f32[64,2], index: 6, kind: output, shape index: {2}]  }
   0x1 LB: > { %s547_s22 = sadd.s32 4294967295, %s606_s21   ;;  %p551_p0 = scmp.ge.s32.totalorder %s606_s21, 1  ;;  %s606_s21 = sphi %s643_s21, %s17_s21  }
   0x2   : > { %p218_p1 = scmp.lt.s32.totalorder %s606_s21, 3 }
   0x4   : > { %p219_p2 = pnand %p551_p0, %p218_p1 }
   0x5   : > { %s552_s25 = sshll.u32 (!%p219_p2), %s547_s22, 2 }
   0x6   : > { %222 = sbr.rel (%p219_p2) target bundleno = 292 (0x124), region = 36  ;;  %p259_p3 = scmp.lt.s32.totalorder (!%p219_p2), %s552_s25, 7 }
   0xb   : > { %v586_v0 = vld [vmem:[%s708_s1] sm:$0xff]  ;;  %v341_v1 = vld [vmem:[%s709_s2 + $0x8] sm:$0xff]  ;;  %s715_s25 = smov (!%p259_p3, %s552_s25), 7  ;;  %vm305_vm0 = vcmask 130048   ;;  %vm335_vm1 = vcmask 125952   ;;  %vm383_vm2 = vcmask 15360  }
   0xc   : > { %v389_v2 = vld [vmem:[%s710_s3 + $0x8] sm:$0xff]  ;;  %588 = vmatpush.msra.mxu1 %v341_v1  ;;  %319 = vmatpush.bf16.msra.mxu0 %v586_v0  ;;  %s553_s30 = sshll.u32 %s715_s25, 2  ;;  %v340_v5 = vld [vmem:[%s709_s2] sm:$0xff]  ;;  %s557_s17 = sshll.u32 %s715_s25, 3 }
   0xd   : > { %404 = vmatpush.msra.mxu2 %v389_v2  ;;  %587 = vmatpush.bf16.msra.mxu3 %v586_v0  ;;  %s262_s9 = scalar_lea.vmem %s707_s0, %s553_s30  ;;  %v388_v6 = vld [vmem:[%s710_s3] sm:$0xff]  ;;  %s268_s16 = scalar_lea.vmem %s711_s4, %s553_s30 }
   0xe   : > { %v584_v3 = vld [vmem:[%s262_s9] sm:$0xff]  ;;  %v585_v4 = vld [vmem:[%s262_s9 + $0x8] sm:$0xff]  ;;  %589 = vmatpush.msra.mxu1 %v340_v5  ;;  %s274_s20 = scalar_lea.vmem %s712_s5, %s557_s17  ;;  %s280_s24 = scalar_lea.vmem %s713_s6, %s557_s17 }
   0xf   : > { %572 = vmatmul.msk.bf16.vlgmr.msra.gmra.mxu0 %vm305_vm0, %v584_v3  ;;  %405 = vmatpush.msra.mxu2 %v388_v6 }
  0x10   : > { %368 = vmatpush.msrb.mxu0 %v341_v1  ;;  %573 = vmatmul.msk.bf16.vlgmr.msra.gmra.mxu3 %vm305_vm0, %v585_v4 }
  0x11   : > { %590 = vmatpush.msrb.mxu3 %v389_v2 }
  0x12   : > { %369 = vmatpush.msrb.mxu0 %v340_v5 }
  0x13   : > { %591 = vmatpush.msrb.mxu3 %v388_v6 }
  0x8c   : > { %v321_v7 = vpop.f32.mrf.mxu0 }
  0x8d   : > { %v331_v8 = vpack.c.bf16 %v321_v7, %v321_v7  ;;  %574 = vmatmul.msk.f32.vlgmr.msrb.gmra.mxu0 %vm305_vm0, %v321_v7  ;;  %578 = vmatmul.msk.f32.vlgmr.msra.gmra.mxu2 %vm305_vm0, %v321_v7 }
  0x8f   : > { %336 = vst.msk [vmem:[%s268_s16] sm:$0xf] %vm335_vm1, %v331_v8 }
  0x93   : > { %v326_v9 = vpop.f32.mrf.mxu3 }
  0x94   : > { %v333_v10 = vpack.c.bf16 %v326_v9, %v326_v9  ;;  %v323_v11 = vpop.f32.mrf.mxu0 }
  0x95   : > { %v332_v12 = vpack.c.bf16 %v323_v11, %v323_v11  ;;  %575 = vmatmul.msk.f32.vlgmr.msra.gmra.mxu1 %vm305_vm0, %v323_v11  ;;  %579 = vmatmul.msk.f32.gmra.mxu2 %vm305_vm0, %v323_v11 }
  0x96   : > { %338 = vst.msk [vmem:[%s268_s16 + $0x8] sm:$0xf] %vm335_vm1, %v333_v10 }
  0x97   : > { %337 = vst.msk [vmem:[%s268_s16 + $0x4] sm:$0xf] %vm335_vm1, %v332_v12 }
  0x9b   : > { %v328_v13 = vpop.f32.mrf.mxu3 }
  0x9c   : > { %v334_v14 = vpack.c.bf16 %v328_v13, %v328_v13  ;;  %581 = vmatmul.msk.f32.vlgmr.msrb.gmra.mxu3 %vm305_vm0, %v328_v13 }
  0x9d   : > { %576 = vmatmul.msk.f32.gmra.mxu1 %vm305_vm0, %v326_v9  ;;  %580 = vmatmul.msk.f32.gmra.mxu2 %vm305_vm0, %v326_v9 }
  0x9e   : > { %339 = vst.msk [vmem:[%s268_s16 + $0xc] sm:$0xf] %vm335_vm1, %v334_v14 }
  0xa5   : > { %577 = vmatmul.msk.f32.gmra.mxu1 %vm305_vm0, %v328_v13 }
 0x10a   : > { %v371_v15 = vpop.f32.mrf.mxu0 }
 0x10b   : > { %384 = vst.msk [vmem:[%s274_s20] sm:$0xff] %vm383_vm2, %v371_v15 }
 0x110   : > { %v407_v16 = vpop.f32.mrf.mxu2 }
 0x111   : > { %419 = vst.msk [vmem:[%s280_s24] sm:$0xff] %vm383_vm2, %v407_v16 }
 0x112   : > { %v374_v17 = vpop.f32.mrf.mxu1 }
 0x113   : > { %385 = vst.msk [vmem:[%s274_s20 + $0x8] sm:$0xff] %vm383_vm2, %v374_v17 }
 0x118   : > { %v410_v18 = vpop.f32.mrf.mxu2 }
 0x119   : > { %420 = vst.msk [vmem:[%s280_s24 + $0x8] sm:$0xff] %vm383_vm2, %v410_v18 }
 0x11a   : > { %v377_v19 = vpop.f32.mrf.mxu1 }
 0x11b   : > { %386 = vst.msk [vmem:[%s274_s20 + $0x10] sm:$0xff] %vm383_vm2, %v377_v19 }
 0x11f   : > { %v416_v21 = vpop.f32.mrf.mxu3 }
 0x120   : > { %v413_v20 = vpop.f32.mrf.mxu2  ;;  %422 = vst.msk [vmem:[%s280_s24 + $0x18] sm:$0xff] %vm383_vm2, %v416_v21 }
 0x121   : > { %421 = vst.msk [vmem:[%s280_s24 + $0x10] sm:$0xff] %vm383_vm2, %v413_v20 }
 0x122   : > { %v380_v22 = vpop.f32.mrf.mxu1 }
 0x123   : > { %387 = vst.msk [vmem:[%s274_s20 + $0x18] sm:$0xff] %vm383_vm2, %v380_v22 }
 0x124 PF: > { %s17_s21 = sadd.s32 1, %s606_s21  }
 0x125   : > { %p14_p4 = scmp.ge.s32.totalorder %s17_s21, 4  }
 0x127   :  { %16 = sbr.rel (!%p14_p4) target bundleno = 1 (0x1), region = 90 }

</bundles_post_ra>
